<compile_context>
chip_gen: v7x
topology: tpu7x:2x2x1
jax: 0.10.0
libtpu: 0.0.40
codegen_flags: <defaults>
</compile_context>

<pallas_src>
import jax
import jax.numpy as jnp
from jax import lax
from jax.experimental import pallas as pl
from jax.experimental.pallas import tpu as pltpu

IN_FEATURES = 8
LAYER_DIMS = [(8, 64), (64, 32), (32, 16), (16, 1)]   # (fan_in, fan_out) per layer
NUM_LAYERS = len(LAYER_DIMS)
MAX_OUT = 64          # largest fan_out -> slab sublane extent
PAD_LANES = 128       # slab lane extent (largest fan_in padded to one lane tile)


def _mlp_kernel(x_ref, w_ref, b_ref, o_ref):
    # x_ref: (TB, 8)        batch-tile x features, native HBM layout (no transpose upstream)
    # w_ref: (4, 64, 128)   per-layer (out, in) weights, zero-padded, VMEM-resident
    # b_ref: (4, 64, 1)     per-layer biases as column vectors, zero-padded
    # o_ref: (1, TB)        final output row (lane-dense over batch)

    # Layer 1: contract (64, 8) with (TB, 8) on the minor dims -> (64, TB).
    # This puts the batch on the 128-lane axis inside the kernel; everything
    # downstream (bias, ReLU, stores) is lane-dense.
    h = lax.dot_general(
        w_ref[0, :, :IN_FEATURES], x_ref[...],
        dimension_numbers=(((1,), (1,)), ((), ())),
        preferred_element_type=jnp.float32)
    h = jnp.maximum(h + b_ref[0], 0.0)                                   # (64, TB)

    # Layer 2: (32, 64) @ (64, TB) -> (32, TB).  Slice starts/sizes are all
    # multiples of 8 sublanes, so slices stay tile-aligned and exact.
    h = jnp.dot(w_ref[1, :32, :64], h, preferred_element_type=jnp.float32)
    h = jnp.maximum(h + b_ref[1, :32], 0.0)

    # Layer 3: (16, 32) @ (32, TB) -> (16, TB)
    h = jnp.dot(w_ref[2, :16, :32], h, preferred_element_type=jnp.float32)
    h = jnp.maximum(h + b_ref[2, :16], 0.0)

    # Layer 4 (no activation): (8, 16) @ (16, TB) -> (8, TB); rows 1..7 of
    # W4/b4 are zero padding so only row 0 carries the real (16 -> 1) output.
    h = jnp.dot(w_ref[3, :8, :16], h, preferred_element_type=jnp.float32)
    h = h + b_ref[3, :8]
    o_ref[...] = h[:1, :].astype(o_ref.dtype)


def _round_up(n, m):
    return ((n + m - 1) // m) * m


def _pick_batch_tile(batch, batch_tile):
    # Multiple of 128 lanes, capped at batch_tile, and chosen so the grid keeps
    # >= 4 tiles whenever the batch is big enough (keeps both v7x TensorCores
    # fed via the "parallel" axis and the per-core prefetch pipeline alive).
    quarter = _round_up(-(-batch // 4), 128)
    return max(128, min(batch_tile, quarter))


def pack_params(params):
    """Pack per-layer (out,in) weights / (out,) biases into two padded slabs."""
    w_slab = jnp.zeros((NUM_LAYERS, MAX_OUT, PAD_LANES), jnp.float32)
    b_slab = jnp.zeros((NUM_LAYERS, MAX_OUT, 1), jnp.float32)
    for l, (fan_in, fan_out) in enumerate(LAYER_DIMS):
        w = params[f"w{l + 1}"]            # (fan_out, fan_in), PyTorch layout
        b = params[f"b{l + 1}"]            # (fan_out,)
        w_slab = w_slab.at[l, :fan_out, :fan_in].set(w)
        b_slab = b_slab.at[l, :fan_out, 0].set(b)
    return w_slab, b_slab


def regression_model_forward(x, w_slab, b_slab, *, batch_tile=2048):
    """x: (batch, 8) float32. w_slab/b_slab: from pack_params. Returns (batch, 1)."""
    B = x.shape[0]
    tb = _pick_batch_tile(B, batch_tile)
    num_tiles = pl.cdiv(B, tb)
    Bp = num_tiles * tb

    # Only a contiguous tail pad (no transpose, no full re-write of x) when the
    # batch is not a multiple of the tile.
    x_pad = x if Bp == B else jnp.pad(x, ((0, Bp - B), (0, 0)))

    out_T = pl.pallas_call(
        _mlp_kernel,
        out_shape=jax.ShapeDtypeStruct((1, Bp), jnp.float32),
        grid=(num_tiles,),
        in_specs=[
            pl.BlockSpec((tb, IN_FEATURES), lambda i: (i, 0)),                 # x tile
            pl.BlockSpec((NUM_LAYERS, MAX_OUT, PAD_LANES), lambda i: (0, 0, 0)),  # weights, resident
            pl.BlockSpec((NUM_LAYERS, MAX_OUT, 1), lambda i: (0, 0, 0)),          # biases, resident
        ],
        out_specs=pl.BlockSpec((1, tb), lambda i: (0, i)),
        compiler_params=pltpu.CompilerParams(
            dimension_semantics=("parallel",)),
    )(x_pad, w_slab, b_slab)

    return out_T[0, :B].reshape(B, 1)


def init_params(key):
    """PyTorch nn.Linear default init: U(-1/sqrt(fan_in), +1/sqrt(fan_in)).

    Weights stored in PyTorch layout (fan_out, fan_in); biases (fan_out,)."""
    params = {}
    for i, (fan_in, fan_out) in enumerate(LAYER_DIMS, start=1):
        key, kw, kb = jax.random.split(key, 3)
        bound = 1.0 / (fan_in ** 0.5)
        params[f"w{i}"] = jax.random.uniform(
            kw, (fan_out, fan_in), jnp.float32, -bound, bound)
        params[f"b{i}"] = jax.random.uniform(
            kb, (fan_out,), jnp.float32, -bound, bound)
    return params


def _reference_forward(x, params):
    h = x
    for i in (1, 2, 3):
        h = jnp.maximum(h @ params[f"w{i}"].T + params[f"b{i}"], 0.0)
    return h @ params["w4"].T + params["b4"]


if __name__ == "__main__":
    key = jax.random.PRNGKey(0)
    key, kx_small, kx_big = jax.random.split(key, 3)
    params = init_params(key)
    w_slab, b_slab = pack_params(params)

    # Small batch: single 128-lane tile, grid=(1,).
    x_small = jax.random.normal(kx_small, (8, IN_FEATURES), jnp.float32)
    out_small = jax.block_until_ready(
        regression_model_forward(x_small, w_slab, b_slab))
    ref_small = _reference_forward(x_small, params)
    assert out_small.shape == (8, 1)
    assert jnp.allclose(out_small, ref_small, atol=1e-4, rtol=1e-4), \
        "small-batch mismatch vs JAX reference"

    # Larger, non-multiple-of-tile batch: exercises the batch grid (4 tiles of
    # 256 under the >=4-tile rule) and the tail-pad / slice path.
    x_big = jax.random.normal(kx_big, (1000, IN_FEATURES), jnp.float32)
    out_big = jax.block_until_ready(
        regression_model_forward(x_big, w_slab, b_slab))
    ref_big = _reference_forward(x_big, params)
    assert out_big.shape == (1000, 1)
    assert jnp.allclose(out_big, ref_big, atol=1e-4, rtol=1e-4), \
        "tiled-batch mismatch vs JAX reference"

    print("KERNEL_OK")
</pallas_src>

<mosaic_0001>
module attributes {stable_mosaic.version = 11 : i64} {
  func.func @_mlp_kernel(%arg0: i32, %arg1: memref<128x8xf32, #tpu.memory_space<vmem>>, %arg2: memref<4x64x128xf32, #tpu.memory_space<vmem>>, %arg3: memref<4x64x1xf32, #tpu.memory_space<vmem>>, %arg4: memref<1x128xf32, #tpu.memory_space<vmem>>) attributes {dimension_semantics = [#tpu.dimension_semantics<parallel>], iteration_bounds = array<i64: 1>, scalar_prefetch = 0 : i64, scratch_operands = 0 : i64, tpu.core_type = #tpu.core_type<tc>, window_params = [{transform_indices = @transform_0, window_bounds = array<i64: 128, 8>}, {pipeline_mode = #tpu.pipeline_mode<synchronous>, transform_indices = @transform_1, window_bounds = array<i64: 4, 64, 128>}, {pipeline_mode = #tpu.pipeline_mode<synchronous>, transform_indices = @transform_2, window_bounds = array<i64: 4, 64, 1>}, {transform_indices = @transform_3, window_bounds = array<i64: 1, 128>}]} {
    %c0 = arith.constant 0 : index
    %c0_0 = arith.constant 0 : index
    %c0_1 = arith.constant 0 : index
    %0 = vector.load %arg2[%c0, %c0_0, %c0_1] : memref<4x64x128xf32, #tpu.memory_space<vmem>>, vector<1x64x8xf32>
    %1 = vector.shape_cast %0 : vector<1x64x8xf32> to vector<64x8xf32>
    %c0_2 = arith.constant 0 : index
    %c0_3 = arith.constant 0 : index
    %2 = vector.load %arg1[%c0_2, %c0_3] : memref<128x8xf32, #tpu.memory_space<vmem>>, vector<128x8xf32>
    %cst = arith.constant dense<0.000000e+00> : vector<64x128xf32>
    %3 = tpu.matmul %1, %2, %cst {dimension_numbers = #tpu.dot_dimension_numbers<[1], [1], [0], [0], [0, 0, 1, 0], [], []>} : vector<64x8xf32>, vector<128x8xf32>, vector<64x128xf32> -> vector<64x128xf32>
    %c0_4 = arith.constant 0 : index
    %c0_5 = arith.constant 0 : index
    %c0_6 = arith.constant 0 : index
    %4 = vector.load %arg3[%c0_4, %c0_5, %c0_6] : memref<4x64x1xf32, #tpu.memory_space<vmem>>, vector<1x64x1xf32>
    %5 = vector.shape_cast %4 : vector<1x64x1xf32> to vector<64x1xf32>
    %6 = vector.broadcast %5 : vector<64x1xf32> to vector<64x128xf32>
    %7 = arith.addf %3, %6 : vector<64x128xf32>
    %cst_7 = arith.constant 0.000000e+00 : f32
    %8 = vector.broadcast %cst_7 : f32 to vector<64x128xf32>
    %9 = arith.maximumf %7, %8 : vector<64x128xf32>
    %c1 = arith.constant 1 : index
    %c0_8 = arith.constant 0 : index
    %c0_9 = arith.constant 0 : index
    %10 = vector.load %arg2[%c1, %c0_8, %c0_9] : memref<4x64x128xf32, #tpu.memory_space<vmem>>, vector<1x32x64xf32>
    %11 = vector.shape_cast %10 : vector<1x32x64xf32> to vector<32x64xf32>
    %cst_10 = arith.constant dense<0.000000e+00> : vector<32x128xf32>
    %12 = tpu.matmul %11, %9, %cst_10 {dimension_numbers = #tpu.dot_dimension_numbers<[1], [0], [0], [1], [0, 0, 1, 1], [], []>} : vector<32x64xf32>, vector<64x128xf32>, vector<32x128xf32> -> vector<32x128xf32>
    %c1_11 = arith.constant 1 : index
    %c0_12 = arith.constant 0 : index
    %c0_13 = arith.constant 0 : index
    %13 = vector.load %arg3[%c1_11, %c0_12, %c0_13] : memref<4x64x1xf32, #tpu.memory_space<vmem>>, vector<1x32x1xf32>
    %14 = vector.shape_cast %13 : vector<1x32x1xf32> to vector<32x1xf32>
    %15 = vector.broadcast %14 : vector<32x1xf32> to vector<32x128xf32>
    %16 = arith.addf %12, %15 : vector<32x128xf32>
    %cst_14 = arith.constant 0.000000e+00 : f32
    %17 = vector.broadcast %cst_14 : f32 to vector<32x128xf32>
    %18 = arith.maximumf %16, %17 : vector<32x128xf32>
    %c2 = arith.constant 2 : index
    %c0_15 = arith.constant 0 : index
    %c0_16 = arith.constant 0 : index
    %19 = vector.load %arg2[%c2, %c0_15, %c0_16] : memref<4x64x128xf32, #tpu.memory_space<vmem>>, vector<1x16x32xf32>
    %20 = vector.shape_cast %19 : vector<1x16x32xf32> to vector<16x32xf32>
    %cst_17 = arith.constant dense<0.000000e+00> : vector<16x128xf32>
    %21 = tpu.matmul %20, %18, %cst_17 {dimension_numbers = #tpu.dot_dimension_numbers<[1], [0], [0], [1], [0, 0, 1, 1], [], []>} : vector<16x32xf32>, vector<32x128xf32>, vector<16x128xf32> -> vector<16x128xf32>
    %c2_18 = arith.constant 2 : index
    %c0_19 = arith.constant 0 : index
    %c0_20 = arith.constant 0 : index
    %22 = vector.load %arg3[%c2_18, %c0_19, %c0_20] : memref<4x64x1xf32, #tpu.memory_space<vmem>>, vector<1x16x1xf32>
    %23 = vector.shape_cast %22 : vector<1x16x1xf32> to vector<16x1xf32>
    %24 = vector.broadcast %23 : vector<16x1xf32> to vector<16x128xf32>
    %25 = arith.addf %21, %24 : vector<16x128xf32>
    %cst_21 = arith.constant 0.000000e+00 : f32
    %26 = vector.broadcast %cst_21 : f32 to vector<16x128xf32>
    %27 = arith.maximumf %25, %26 : vector<16x128xf32>
    %c3 = arith.constant 3 : index
    %c0_22 = arith.constant 0 : index
    %c0_23 = arith.constant 0 : index
    %28 = vector.load %arg2[%c3, %c0_22, %c0_23] : memref<4x64x128xf32, #tpu.memory_space<vmem>>, vector<1x8x16xf32>
    %29 = vector.shape_cast %28 : vector<1x8x16xf32> to vector<8x16xf32>
    %cst_24 = arith.constant dense<0.000000e+00> : vector<8x128xf32>
    %30 = tpu.matmul %29, %27, %cst_24 {dimension_numbers = #tpu.dot_dimension_numbers<[1], [0], [0], [1], [0, 0, 1, 1], [], []>} : vector<8x16xf32>, vector<16x128xf32>, vector<8x128xf32> -> vector<8x128xf32>
    %c3_25 = arith.constant 3 : index
    %c0_26 = arith.constant 0 : index
    %c0_27 = arith.constant 0 : index
    %31 = vector.load %arg3[%c3_25, %c0_26, %c0_27] : memref<4x64x1xf32, #tpu.memory_space<vmem>>, vector<1x8x1xf32>
    %32 = vector.shape_cast %31 : vector<1x8x1xf32> to vector<8x1xf32>
    %33 = vector.broadcast %32 : vector<8x1xf32> to vector<8x128xf32>
    %34 = arith.addf %30, %33 : vector<8x128xf32>
    %35 = vector.extract_strided_slice %34 {offsets = [0, 0], sizes = [1, 128], strides = [1, 1]} : vector<8x128xf32> to vector<1x128xf32>
    %c0_28 = arith.constant 0 : index
    %c0_29 = arith.constant 0 : index
    %36 = vector.load %arg4[%c0_28, %c0_29] : memref<1x128xf32, #tpu.memory_space<vmem>>, vector<1x128xf32>
    tpu.vector_store %arg4[%c0_28, %c0_29], %35 {strides = array<i32>} : memref<1x128xf32, #tpu.memory_space<vmem>>, vector<1x128xf32>,
    return
  }
  func.func @transform_0(%arg0: i32) -> (i32, i32) {
    %c0_i32 = arith.constant 0 : i32
    %c0_i32_0 = arith.constant 0 : i32
    return %arg0, %c0_i32 : i32, i32
  }
  func.func @transform_1(%arg0: i32) -> (i32, i32, i32) {
    %c0_i32 = arith.constant 0 : i32
    %c0_i32_0 = arith.constant 0 : i32
    %c0_i32_1 = arith.constant 0 : i32
    %c0_i32_2 = arith.constant 0 : i32
    return %c0_i32, %c0_i32_0, %c0_i32_1 : i32, i32, i32
  }
  func.func @transform_2(%arg0: i32) -> (i32, i32, i32) {
    %c0_i32 = arith.constant 0 : i32
    %c0_i32_0 = arith.constant 0 : i32
    %c0_i32_1 = arith.constant 0 : i32
    %c0_i32_2 = arith.constant 0 : i32
    return %c0_i32, %c0_i32_0, %c0_i32_1 : i32, i32, i32
  }
  func.func @transform_3(%arg0: i32) -> (i32, i32) {
    %c0_i32 = arith.constant 0 : i32
    %c0_i32_0 = arith.constant 0 : i32
    return %c0_i32, %arg0 : i32, i32
  }
}

</mosaic_0001>

<bundles_post_ra>
// kernel: tpu_custom_call.1
= control target key start
LH: loop header
LB: loop body
LE: loop exit
PB: predicated region body
PF: predicated region fallthrough
CT: control target
= control target key end

     0   :  { %vm87_vm0 = vcmask 64512   ;;  %v883_v6 = vmov 0   ;;  %s1110_s0 = inlined_call_operand.vmem [shape: f32[128,8], index: 0, kind: input, shape index: {}]   ;;  %s1111_s1 = inlined_call_operand.vmem [shape: f32[4,64,128], index: 1, kind: input, shape index: {}]   ;;  %s1112_s2 = inlined_call_operand.vmem [shape: f32[4,64,1], index: 2, kind: input, shape index: {}]   ;;  %s1113_s3 = inlined_call_operand.hbm [shape: f32[1,128], index: 3, kind: output, shape index: {}]  }
   0x1   :  { %v23_v0 = vld [vmem:[%s1110_s0] sm:$0xff]  ;;  %v24_v1 = vld [vmem:[%s1110_s0 + $0x8] sm:$0xff]  ;;  %v25_v2 = vld [vmem:[%s1110_s0 + $0x10] sm:$0xff]  ;;  %857 = vset.pattern.permute.xlu0 %v883_v6  ;;  %858 = vset.pattern.permute.xlu1 %v883_v6 }
   0x2   :  { %v777_v3 = vpack.c.bf16 %v24_v1, %v23_v0  ;;  %vm919_vm1 = vmpackc.low %vm87_vm0, %vm87_vm0  ;;  %v26_v5 = vld [vmem:[%s1110_s0 + $0x18] sm:$0xff]  ;;  %v15_v8 = vld [vmem:[%s1111_s1] sm:$0xff] }
   0x3   :  { %v783_v7 = vpack.c.bf16 %v26_v5, %v25_v2  ;;  %v27_v9 = vld [vmem:[%s1110_s0 + $0x20] sm:$0xff]  ;;  %v28_v10 = vld [vmem:[%s1110_s0 + $0x28] sm:$0xff]  ;;  %725 = vmatprep.mubr.msk.f32.mxu0 %vm87_vm0, %v15_v8  ;;  %v41_v13 = vld [vmem:[%s1112_s2 + $0x10] sm:$0xff] }
   0x4   :  { %779 = vmatprep.subr.msk.bf16.mxu0 %vm919_vm1, %v777_v3  ;;  %v39_v11 = vld [vmem:[%s1112_s2] sm:$0xff]  ;;  %v789_v12 = vpack.c.bf16 %v28_v10, %v27_v9  ;;  %v40_v14 = vld [vmem:[%s1112_s2 + $0x8] sm:$0xff]  ;;  %59 = vperm.xlu1 %858, %v41_v13   ;;  %v42_v15 = vld [vmem:[%s1112_s2 + $0x18] sm:$0xff] }
   0x5   :  { %782 = vmatpush3.bf16.xpose.msk.msra.mxu0 %vm919_vm1, %v777_v3  ;;  %49 = vperm.xlu0 %857, %v39_v11  }
   0x6   :  { %785 = vmatprep.subr.msk.bf16.mxu0 %vm919_vm1, %v783_v7 }
   0x9   :  { %54 = vperm.xlu0 %857, %v40_v14  }
   0xd   :  { %788 = vmatpush3.bf16.xpose.msk.msra.mxu0 %vm919_vm1, %v783_v7 }
   0xe   :  { %791 = vmatprep.subr.msk.bf16.mxu0 %vm919_vm1, %v789_v12 }
   0xf   :  { %8 = vsyncpa [#allocation3], 0  ;;  %v29_v16 = vld [vmem:[%s1110_s0 + $0x30] sm:$0xff]  ;;  %v30_v17 = vld [vmem:[%s1110_s0 + $0x38] sm:$0xff]  ;;  %64 = vperm.xlu1 %858, %v42_v15   ;;  %vm303_vm2 = vcmask 523264   ;;  %vm421_vm3 = vcmask 261120  }
  0x10   :  { %v43_v18 = vld [vmem:[%s1112_s2 + $0x20] sm:$0xff]  ;;  %v44_v19 = vld [vmem:[%s1112_s2 + $0x28] sm:$0xff]  ;;  %v795_v20 = vpack.c.bf16 %v30_v17, %v29_v16  ;;  %v45_v21 = vld [vmem:[%s1112_s2 + $0x30] sm:$0xff]  ;;  %vm885_vm4 = vmmov 0   ;;  %vm514_vm5 = vcmask 130048   ;;  %s887_s20 = smov [#allocation2]  }
  0x11   :  { %69 = vperm.xlu0 %857, %v43_v18   ;;  %v46_v22 = vld [vmem:[%s1112_s2 + $0x38] sm:$0xff]  ;;  %v31_v23 = vld [vmem:[%s1110_s0 + $0x40] sm:$0xff]  ;;  %v32_v24 = vld [vmem:[%s1110_s0 + $0x48] sm:$0xff]  ;;  %s595_s21 = sshll.u32 %s887_s20, 4  ;;  %s596_s21 = int_to_ptr.vmem [resolvable:$true] %s595_s21 }
  0x12   :  { %v631_v25 = vld [vmem:[%s1112_s2 + $0x40] sm:$0xff]  ;;  %v632_v26 = vld [vmem:[%s1112_s2 + $0x48] sm:$0xff]  ;;  %v801_v27 = vpack.c.bf16 %v32_v24, %v31_v23  ;;  %v633_v28 = vld [vmem:[%s1112_s2 + $0x50] sm:$0xff]  ;;  %s859_s22 = scalar_lea.vmem %s596_s21, 16  ;;  %s863_s23 = scalar_lea.vmem %s596_s21, 32 }
  0x13   :  { %74 = vperm.xlu1 %858, %v44_v19   ;;  %v634_v29 = vld [vmem:[%s1112_s2 + $0x58] sm:$0xff]  ;;  %v33_v30 = vld [vmem:[%s1110_s0 + $0x50] sm:$0xff]  ;;  %v641_v32 = vld [vmem:[%s1112_s2 + $0x80] sm:$0xff]  ;;  %p860_p0 = scmp.ne.s32.totalorder %s596_s21, %s859_s22  ;;  %p864_p1 = scmp.lt.s32.totalorder %s596_s21, %s596_s21 }
  0x14   :  { %v34_v31 = vld [vmem:[%s1110_s0 + $0x58] sm:$0xff]  ;;  %v642_v33 = vld [vmem:[%s1112_s2 + $0x88] sm:$0xff]  ;;  %v646_v35 = vld [vmem:[%s1112_s2 + $0xc0] sm:$0xff]  ;;  %p865_p2 = scmp.lt.s32.totalorder %s863_s23, %s859_s22 }
  0x15   :  { %794 = vmatpush3.bf16.xpose.msk.msra.mxu0 %vm919_vm1, %v789_v12  ;;  %79 = vperm.xlu0 %857, %v45_v21   ;;  %v807_v34 = vpack.c.bf16 %v34_v31, %v33_v30  ;;  %v35_v36 = vld [vmem:[%s1110_s0 + $0x60] sm:$0xff]  ;;  %v36_v37 = vld [vmem:[%s1110_s0 + $0x68] sm:$0xff]  ;;  %v37_v39 = vld [vmem:[%s1110_s0 + $0x70] sm:$0xff] }
  0x16   :  { %797 = vmatprep.subr.msk.bf16.mxu0 %vm919_vm1, %v795_v20  ;;  %v813_v38 = vpack.c.bf16 %v36_v37, %v35_v36  ;;  %v38_v40 = vld [vmem:[%s1110_s0 + $0x78] sm:$0xff]  ;;  %v16_v42 = vld [vmem:[%s1111_s1 + $0x8] sm:$0xff]  ;;  %v17_v43 = vld [vmem:[%s1111_s1 + $0x10] sm:$0xff]  ;;  %p866_p3 = por %p865_p2, %p864_p1 }
  0x17   :  { %84 = vperm.xlu1 %858, %v46_v22   ;;  %v819_v41 = vpack.c.bf16 %v38_v40, %v37_v39  ;;  %v18_v44 = vld [vmem:[%s1111_s1 + $0x18] sm:$0xff]  ;;  %v19_v45 = vld [vmem:[%s1111_s1 + $0x20] sm:$0xff]  ;;  %v20_v46 = vld [vmem:[%s1111_s1 + $0x28] sm:$0xff] }
  0x18   :  { %v21_v47 = vld [vmem:[%s1111_s1 + $0x30] sm:$0xff]  ;;  %v22_v48 = vld [vmem:[%s1111_s1 + $0x38] sm:$0xff]  ;;  %v627_v49 = vld [vmem:[%s1111_s1 + $0x40] sm:$0xff]  ;;  %p867_p4 = pnand %p866_p3, %p860_p0 }
  0x19   :  { %285 = vperm.xlu0 %857, %v631_v25   ;;  %753 = vmatprep.mubr.msk.f32.mxu1 %vm303_vm2, %v627_v49  ;;  %v628_v22 = vld [vmem:[%s1111_s1 + $0x48] sm:$0xff]  ;;  %v629_v23 = vld [vmem:[%s1111_s1 + $0x50] sm:$0xff]  ;;  %v630_v24 = vld [vmem:[%s1111_s1 + $0x58] sm:$0xff] }
  0x1a   :  { %v639_v25 = vld [vmem:[%s1111_s1 + $0x80] sm:$0xff] }
  0x1b   :  { %290 = vperm.xlu1 %858, %v632_v26  }
  0x1d   :  { %800 = vmatpush3.bf16.xpose.msk.msra.mxu0 %vm919_vm1, %v795_v20  ;;  %295 = vperm.xlu0 %857, %v633_v28  }
  0x1e   :  { %803 = vmatprep.subr.msk.bf16.mxu0 %vm919_vm1, %v801_v27 }
  0x1f   :  { %300 = vperm.xlu1 %858, %v634_v29  }
  0x21   :  { %413 = vperm.xlu0 %857, %v641_v32  }
  0x23   :  { %418 = vperm.xlu1 %858, %v642_v33  }
  0x25   :  { %806 = vmatpush3.bf16.xpose.msk.msra.mxu0 %vm919_vm1, %v801_v27  ;;  %511 = vperm.xlu0 %857, %v646_v35  }
  0x26   :  { %809 = vmatprep.subr.msk.bf16.mxu0 %vm919_vm1, %v807_v34 }
  0x2d   :  { %812 = vmatpush3.bf16.xpose.msk.msra.mxu0 %vm919_vm1, %v807_v34 }
  0x2e   :  { %815 = vmatprep.subr.msk.bf16.mxu0 %vm919_vm1, %v813_v38 }
  0x35   :  { %818 = vmatpush3.bf16.xpose.msk.msra.mxu0 %vm919_vm1, %v813_v38 }
  0x36   :  { %821 = vmatprep.subr.msk.bf16.mxu0 %vm919_vm1, %v819_v41 }
  0x3d   :  { %824 = vmatpush3.bf16.xpose.msk.msra.mxu0 %vm919_vm1, %v819_v41 }
  0x44   :  { %726 = vmatmul.mubr.msk.f32.vlgmr.msra.gmra.mrb[0].mxu0 %vm87_vm0, %v16_v42 }
  0x45   :  { %728 = vmatprep.mubr.msk.f32.mxu0 %vm87_vm0, %v17_v43 }
  0x48   :  { %729 = vmatmul.mubr.msk.f32.gmra.mrb[2].mxu0 %vm87_vm0, %v18_v44  ;;  %v640_v44 = vld [vmem:[%s1111_s1 + $0x88] sm:$0xff] }
  0x49   :  { %731 = vmatprep.mubr.msk.f32.mxu0 %vm87_vm0, %v19_v45  ;;  %v884_v45 = vmov 0.0|0.0  }
  0x4c   :  { %732 = vmatmul.mubr.msk.f32.gmra.mrb[4].mxu0 %vm87_vm0, %v20_v46  ;;  %v886_v46 = vmov 0.0  }
  0x4d   :  { %734 = vmatprep.mubr.msk.f32.mxu0 %vm87_vm0, %v21_v47 }
  0x50   :  { %735 = vmatmul.mubr.msk.f32.gmra.mrb[6].mxu0 %vm87_vm0, %v22_v48 }
  0x83   :  { %v60_v51 = vpop.permute.xlu1 %59 }
  0x84   :  { %v50_v50 = vpop.permute.xlu0 %49 }
  0x88   :  { %v55_v52 = vpop.permute.xlu0 %54 }
  0x8e   :  { %v65_v53 = vpop.permute.xlu1 %64 }
  0x90   :  { %v70_v2 = vpop.permute.xlu0 %69 }
  0x92   :  { %v75_v63 = vpop.permute.xlu1 %74 }
  0x94   :  { %v80_v14 = vpop.permute.xlu0 %79 }
  0x96   :  { %v85_v11 = vpop.permute.xlu1 %84 }
  0x98   :  { %v286_v27 = vpop.permute.xlu0 %285 }
  0x9a   :  { %v291_v26 = vpop.permute.xlu1 %290 }
  0x9c   :  { %v296_v36 = vpop.permute.xlu0 %295 }
  0x9e   :  { %v301_v33 = vpop.permute.xlu1 %300 }
  0xa0   :  { %v414_v49 = vpop.permute.xlu0 %413 }
  0xa2   :  { %v419_v47 = vpop.permute.xlu1 %418 }
 0x117   :  { %v727_v54 = vpop.f32.mrb[0].mxu0 }
 0x118   :  { %v232_v55 = vadd.f32 %v727_v54, %v55_v52  ;;  %v226_v56 = vpop.f32.mrb[1].mxu0 }
 0x119   :  { %v227_v57 = vadd.f32 %v226_v56, %v50_v50  ;;  %v645_v56 = vld [vmem:[%s1111_s1 + $0xc0] sm:$0xff] }
 0x11a   :  { %v266_v58 = vmax.f32 %v232_v55, 0.0 }
 0x11b   :  { %v265_v59 = vmax.f32 %v227_v57, 0.0  ;;  %v730_v60 = vpop.f32.mrb[2].mxu0  ;;  %v512_v57 = vpop.permute.xlu0 %511 }
 0x11c   :  { %v242_v61 = vadd.f32 %v730_v60, %v65_v53  ;;  %v236_v62 = vpop.f32.mrb[3].mxu0 }
 0x11d   :  { %v237_v0 = vadd.f32 %v236_v62, %v60_v51  ;;  %v825_v1 = vpack.c.bf16 %v266_v58, %v265_v59 }
 0x11e   :  { %v268_v3 = vmax.f32 %v242_v61, 0.0 }
 0x11f   :  { %v267_v4 = vmax.f32 %v237_v0, 0.0  ;;  %v733_v5 = vpop.f32.mrb[4].mxu0  ;;  %826 = vmatprep.subr.bf16.mxu1 %v825_v1 }
 0x120   :  { %v252_v6 = vadd.f32 %v733_v5, %v75_v63  ;;  %v246_v7 = vpop.f32.mrb[5].mxu0  ;;  %828 = vmatpush3.bf16.msra.mxu1 %v825_v1 }
 0x121   :  { %v829_v8 = vpack.c.bf16 %v268_v3, %v267_v4  ;;  %v247_v9 = vadd.f32 %v246_v7, %v70_v2 }
 0x122   :  { %v270_v10 = vmax.f32 %v252_v6, 0.0 }
 0x123   :  { %v269_v12 = vmax.f32 %v247_v9, 0.0  ;;  %v736_v13 = vpop.f32.mrb[6].mxu0  ;;  %830 = vmatprep.subr.bf16.mxu1 %v829_v8 }
 0x124   :  { %v262_v15 = vadd.f32 %v736_v13, %v85_v11  ;;  %v256_v16 = vpop.f32.mrb[7].mxu0  ;;  %832 = vmatpush3.bf16.msra.mxu1 %v829_v8 }
 0x125   :  { %v833_v17 = vpack.c.bf16 %v270_v10, %v269_v12  ;;  %v257_v18 = vadd.f32 %v256_v16, %v80_v14 }
 0x126   :  { %v272_v19 = vmax.f32 %v262_v15, 0.0 }
 0x127   :  { %v271_v20 = vmax.f32 %v257_v18, 0.0  ;;  %834 = vmatprep.subr.bf16.mxu1 %v833_v17 }
 0x128   :  { %836 = vmatpush3.bf16.msra.mxu1 %v833_v17 }
 0x129   :  { %v837_v21 = vpack.c.bf16 %v272_v19, %v271_v20 }
 0x12b   :  { %838 = vmatprep.subr.bf16.mxu1 %v837_v21 }
 0x12c   :  { %840 = vmatpush3.bf16.msra.mxu1 %v837_v21 }
 0x12f   :  { %754 = vmatmul.mubr.msk.f32.vlgmr.msra.gmra.mrb[0].mxu1 %vm303_vm2, %v628_v22 }
 0x130   :  { %756 = vmatprep.mubr.msk.f32.mxu1 %vm303_vm2, %v629_v23 }
 0x133   :  { %757 = vmatmul.mubr.msk.f32.gmra.mrb[2].mxu1 %vm303_vm2, %v630_v24 }
 0x134   :  { %767 = vmatprep.mubr.msk.f32.mxu1 %vm421_vm3, %v639_v25 }
 0x202   :  { %v755_v28 = vpop.f32.mrb[0].mxu1 }
 0x203   :  { %v388_v29 = vadd.f32 %v755_v28, %v291_v26  ;;  %v382_v30 = vpop.f32.mrb[1].mxu1 }
 0x204   :  { %v383_v31 = vadd.f32 %v382_v30, %v286_v27 }
 0x205   :  { %v402_v32 = vmax.f32 %v388_v29, 0.0 }
 0x206   :  { %v401_v34 = vmax.f32 %v383_v31, 0.0  ;;  %v758_v35 = vpop.f32.mrb[2].mxu1 }
 0x207   :  { %v398_v37 = vadd.f32 %v758_v35, %v301_v33  ;;  %v392_v38 = vpop.f32.mrb[3].mxu1 }
 0x208   :  { %v841_v39 = vpack.c.bf16 %v402_v32, %v401_v34  ;;  %v393_v40 = vadd.f32 %v392_v38, %v296_v36 }
 0x209   :  { %v404_v41 = vmax.f32 %v398_v37, 0.0 }
 0x20a   :  { %v403_v42 = vmax.f32 %v393_v40, 0.0  ;;  %842 = vmatprep.subr.bf16.mxu1 %v841_v39 }
 0x20b   :  { %844 = vmatpush3.bf16.msra.mxu1 %v841_v39 }
 0x20c   :  { %v845_v43 = vpack.c.bf16 %v404_v41, %v403_v42 }
 0x20e   :  { %846 = vmatprep.subr.bf16.mxu1 %v845_v43 }
 0x20f   :  { %848 = vmatpush3.bf16.msra.mxu1 %v845_v43 }
 0x210   :  { %849 = vmatprep.subr.bf16.mxu1 %v884_v45 }
 0x212   :  { %768 = vmatmul.mubr.msk.f32.vlgmr.msra.gmra.mrb[4].mxu1 %vm421_vm3, %v640_v44 }
 0x213   :  { %774 = vmatprep.mubr.msk.f32.mxu1 %vm885_vm4, %v886_v46 }
 0x2e5   :  { %v769_v48 = vpop.f32.mrb[4].mxu1 }
 0x2e6   :  { %v500_v50 = vadd.f32 %v769_v48, %v419_v47  ;;  %v494_v51 = vpop.f32.mrb[5].mxu1 }
 0x2e7   :  { %v495_v52 = vadd.f32 %v494_v51, %v414_v49 }
 0x2e8   :  { %v504_v53 = vmax.f32 %v500_v50, 0.0 }
 0x2e9   :  { %v503_v54 = vmax.f32 %v495_v52, 0.0 }
 0x2eb   :  { %v850_v55 = vpack.c.bf16 %v504_v53, %v503_v54 }
 0x2ed   :  { %851 = vmatpush3.bf16.msra.mxu1 %v850_v55 }
 0x2f0   :  { %775 = vmatmul.mubr.msk.f32.vlgmr.msra.gmra.mrb[6].mxu1 %vm514_vm5, %v645_v56 }
 0x3c3   :  { %v584_v58 = vpop.f32.mrb[6].mxu1 }
 0x3c4   :  { %v585_v59 = vadd.f32 %v584_v58, %v512_v57  ;;  %v776_v60 = vpop.f32.mrb[7].mxu1 }
 0x3c6   :  { %588 = vst [vmem:[#allocation2] sm:$0x1] %v585_v59 }
 0x3c7   :  { %870 = shalt.err (!%p867_p4)
}
 0x3c8   :  { %s871_s0 = scalar_lea.hbm %s1113_s3, 16 }
 0x3c9   :  { %p872_p5 = scmp.ne.s32.totalorder %s1113_s3, %s871_s0  ;;  %p875_p6 = scmp.lt.u32.totalorder %s871_s0, %s1113_s3 }
 0x3cb   :  { %p877_p7 = pnand %p875_p6, %p872_p5 }
 0x3cd   :  { %880 = shalt.err (!%p877_p7)
}
 0x3ce   :  { %598 = dma.vmem_to_hbm [thread:$0]  %s596_s21, 16, %s1113_s3, [#allocation3]  }
 0x3cf   :  { %881 = dma.done.wait [#allocation3], 16  }
 0x3d0   :  { %882 = vsyncadd [#allocation3], 4294967280 }
 0x3d1   :  { %602 = vsyncpa [#allocation3], 1 }

</bundles_post_ra>
